<compile_context>
chip_gen: v6e
topology: v6e:2x2x1
jax: 0.10.0
libtpu: 0.0.40
codegen_flags: <defaults>
</compile_context>

<pallas_src>
import jax
import jax.numpy as jnp
from jax.experimental import pallas as pl
from jax.experimental.pallas import tpu as pltpu


# ----------------------------------------------------------------------------
# helpers
# ----------------------------------------------------------------------------
def _round_up(x, m):
    return (x + m - 1) // m * m


def _pick_tile(n, candidates):
    """Largest candidate that divides n, else n itself (full-extent block)."""
    for t in candidates:
        if n % t == 0:
            return t
    return n


def _pick_q_tile(nq, batch):
    """q-tile; for B==1 prefer tiles giving >= 2 grid steps (2 TCs on v7x)."""
    cands = (128, 64, 32, 16, 8)
    if batch == 1:
        for t in cands:
            if nq % t == 0 and nq // t >= 2:
                return t
    return _pick_tile(nq, cands)


def patchify(img, patch):
    """[B, C, H, W] -> [B, N, C*patch*patch], ordering (C, ph, pw)."""
    B, C, H, W = img.shape
    Hp, Wp = H // patch, W // patch
    x = img.reshape(B, C, Hp, patch, Wp, patch)
    x = x.transpose(0, 2, 4, 1, 3, 5)               # [B, Hp, Wp, C, p, p]
    return x.reshape(B, Hp * Wp, C * patch * patch)


def unpatchify(tokens, reso, patch, C):
    """[B, N, C*patch*patch] -> [B, C, H, W]."""
    B, N, _ = tokens.shape
    Hp, Wp = reso
    x = tokens.reshape(B, Hp, Wp, C, patch, patch)
    x = x.transpose(0, 3, 1, 4, 2, 5)               # [B, C, Hp, p, Wp, p]
    return x.reshape(B, C, Hp * patch, Wp * patch)


# ----------------------------------------------------------------------------
# Kernel 1: M-tiled matmul + bias (patch-embed / KV projection / pixel-proj)
# K and N are always lane-dense multiples of 128 (inputs are padded by the
# callers), so loads/stores are unmasked and the MXU feed is not wasted.
# ----------------------------------------------------------------------------
def _matmul_bias_kernel(x_ref, w_ref, b_ref, o_ref):
    acc = jnp.dot(x_ref[...], w_ref[...], preferred_element_type=jnp.float32)
    o_ref[...] = (acc + b_ref[...]).astype(o_ref.dtype)


def pallas_matmul_bias(x, w, b, out_dtype=jnp.bfloat16, tm_target=512):
    """x: [M, K] bf16, w: [K, N] bf16, b: [N] f32 -> [M, N] out_dtype."""
    M, K = x.shape
    K2, N = w.shape
    assert K == K2
    # M tile: <= tm_target, multiple of 8, and small enough that the grid has
    # >= 2 steps when possible (keeps both v7x TensorCores busy).
    tm = min(tm_target, max(8, _round_up(-(-M // 2), 8)))
    Mp = _round_up(M, tm)
    if Mp != M:
        x = jnp.pad(x, ((0, Mp - M), (0, 0)))
    out = pl.pallas_call(
        _matmul_bias_kernel,
        out_shape=jax.ShapeDtypeStruct((Mp, N), out_dtype),
        grid=(Mp // tm,),
        in_specs=[
            pl.BlockSpec((tm, K), lambda i: (i, 0)),
            pl.BlockSpec((K, N), lambda i: (0, 0)),
            pl.BlockSpec((1, N), lambda i: (0, 0)),
        ],
        out_specs=pl.BlockSpec((tm, N), lambda i: (i, 0)),
        compiler_params=pltpu.CompilerParams(
            dimension_semantics=("parallel",)),
    )(x, w, b.reshape(1, N).astype(jnp.float32))
    return out[:M] if Mp != M else out


# ----------------------------------------------------------------------------
# Kernel 2: fused cross attention (transModule core)
#   Q projection (once per q-tile, kept in VMEM), flash-style online-softmax
#   over Nk tiles against PRE-PROJECTED K^T / V, output projection + bias +
#   single residual, all in one pallas_call.
# ----------------------------------------------------------------------------
def _trans_module_kernel(fc_ref, kt_ref, v_ref, wq_ref, bq_ref, wo_ref, bo_ref,
                         o_ref, q_sc, m_sc, l_sc, acc_sc):
    kv = pl.program_id(2)
    D = q_sc.shape[-1]
    scale = 1.0 / (D ** 0.5)

    @pl.when(kv == 0)
    def _():
        # Q projection for this (batch, q-tile); held in VMEM across kv steps.
        q = jnp.dot(fc_ref[0], wq_ref[...], preferred_element_type=jnp.float32)
        q_sc[...] = ((q + bq_ref[...]) * scale).astype(jnp.bfloat16)
        m_sc[...] = jnp.full_like(m_sc, -jnp.inf)
        l_sc[...] = jnp.zeros_like(l_sc)
        acc_sc[...] = jnp.zeros_like(acc_sc)

    # Scores: K is pre-transposed -> plain [tq, D] x [D, tkv] MXU matmul,
    # no in-loop XLU transpose and no in-loop K/V projection recompute.
    s = jnp.dot(q_sc[...], kt_ref[0],
                preferred_element_type=jnp.float32)             # [tq, tkv]

    # Online softmax update. exp in bf16 (bf16 EUP on v6e/v7x; p is consumed
    # in bf16 by the PV matmul anyway); running stats stay f32.
    m_new = jnp.maximum(m_sc[...], jnp.max(s, axis=-1, keepdims=True))
    alpha = jnp.exp(m_sc[...] - m_new)
    p = jnp.exp((s - m_new).astype(jnp.bfloat16))               # [tq, tkv] bf16
    l_sc[...] = alpha * l_sc[...] + jnp.sum(p.astype(jnp.float32),
                                            axis=-1, keepdims=True)
    acc_sc[...] = alpha * acc_sc[...] + jnp.dot(
        p, v_ref[0], preferred_element_type=jnp.float32)
    m_sc[...] = m_new

    @pl.when(kv == pl.num_programs(2) - 1)
    def _():
        attn = acc_sc[...] * pl.reciprocal(l_sc[...], approx=True)
        out = (jnp.dot(attn.astype(jnp.bfloat16), wo_ref[...],
                       preferred_element_type=jnp.float32) + bo_ref[...])
        # Single residual from content tokens (standard S2WAT-style fusion).
        o_ref[0] = (fc_ref[0].astype(jnp.float32) + out).astype(o_ref.dtype)


def pallas_cross_attention(f_c, k_t, v, w_q, b_q, w_o, b_o):
    """f_c: [B, Nq, D] bf16, k_t: [B, D, Nk] bf16, v: [B, Nk, D] bf16."""
    B, Nq, D = f_c.shape
    _, _, Nk = k_t.shape
    tq = _pick_q_tile(Nq, B)
    tkv = _pick_tile(Nk, (512, 256, 128, 64, 32, 16, 8))
    grid = (B, Nq // tq, Nk // tkv)
    return pl.pallas_call(
        _trans_module_kernel,
        out_shape=jax.ShapeDtypeStruct((B, Nq, D), jnp.bfloat16),
        grid=grid,
        in_specs=[
            pl.BlockSpec((1, tq, D), lambda b, qi, ki: (b, qi, 0)),     # f_c
            pl.BlockSpec((1, D, tkv), lambda b, qi, ki: (b, 0, ki)),    # K^T
            pl.BlockSpec((1, tkv, D), lambda b, qi, ki: (b, ki, 0)),    # V
            pl.BlockSpec((D, D), lambda b, qi, ki: (0, 0)),             # w_q
            pl.BlockSpec((1, D), lambda b, qi, ki: (0, 0)),             # b_q
            pl.BlockSpec((D, D), lambda b, qi, ki: (0, 0)),             # w_o
            pl.BlockSpec((1, D), lambda b, qi, ki: (0, 0)),             # b_o
        ],
        out_specs=pl.BlockSpec((1, tq, D), lambda b, qi, ki: (b, qi, 0)),
        scratch_shapes=[
            pltpu.VMEM((tq, D), jnp.bfloat16),   # scaled Q tile
            pltpu.VMEM((tq, 1), jnp.float32),    # running max
            pltpu.VMEM((tq, 1), jnp.float32),    # running denom
            pltpu.VMEM((tq, D), jnp.float32),    # output accumulator
        ],
        compiler_params=pltpu.CompilerParams(
            dimension_semantics=("parallel", "parallel", "arbitrary")),
    )(f_c, k_t, v,
      w_q, b_q.reshape(1, D).astype(jnp.float32),
      w_o, b_o.reshape(1, D).astype(jnp.float32))


# ----------------------------------------------------------------------------
# Synthetic Sample_Test_Net (encoder / transModule / decoder stand-ins)
# ----------------------------------------------------------------------------
class SampleTestNetPallas:
    def __init__(self, in_chans=3, embed_dim=128, patch_size=8, seed=42):
        assert embed_dim % 128 == 0, "embed_dim kept lane-dense (multiple of 128)"
        self.patch_size = patch_size
        self.in_chans = in_chans
        self.embed_dim = embed_dim
        self.pdim = in_chans * patch_size * patch_size
        self.pdim_pad = _round_up(self.pdim, 128)     # 192 -> 256 (lane-dense)
        keys = jax.random.split(jax.random.PRNGKey(seed), 8)
        s = 0.02

        def w(key, shape):
            return (s * jax.random.normal(key, shape, jnp.float32)).astype(jnp.bfloat16)

        D = embed_dim
        # encoder: patch-embed linear, K zero-padded to pdim_pad.
        w_embed = w(keys[0], (self.pdim, D))
        self.w_embed = jnp.zeros((self.pdim_pad, D), jnp.bfloat16).at[:self.pdim].set(w_embed)
        self.b_embed = jnp.zeros((D,), jnp.float32)
        # transModule: Q projection + fused K/V projection + output projection.
        self.w_q = w(keys[1], (D, D))
        self.b_q = jnp.zeros((D,), jnp.float32)
        self.w_kv = w(keys[2], (D, 2 * D))
        self.b_kv = jnp.zeros((2 * D,), jnp.float32)
        self.w_o = w(keys[3], (D, D))
        self.b_o = jnp.zeros((D,), jnp.float32)
        # decoder: token -> patch pixels, N zero-padded to pdim_pad (lane-dense
        # output; the extra columns are sliced away in the wrapper).
        w_dec = w(keys[4], (D, self.pdim))
        self.w_dec = jnp.zeros((D, self.pdim_pad), jnp.bfloat16).at[:, :self.pdim].set(w_dec)
        self.b_dec = jnp.zeros((self.pdim_pad,), jnp.float32)

    # ---- patch-embed of a (possibly stacked) bf16 image batch ----
    def _embed_tokens(self, imgs_bf16):
        p = self.patch_size
        patches = patchify(imgs_bf16, p)                       # [B', N, pdim] bf16
        Bn, N, pdim = patches.shape
        if self.pdim_pad != pdim:                              # zero-pad K to 256
            patches = jnp.pad(patches, ((0, 0), (0, 0), (0, self.pdim_pad - pdim)))
        tok = pallas_matmul_bias(patches.reshape(Bn * N, self.pdim_pad),
                                 self.w_embed, self.b_embed,
                                 out_dtype=jnp.bfloat16)
        return tok.reshape(Bn, N, self.embed_dim)

    # ---- encoder (single image): returns (tokens, aux, resolution) ----
    def encoder(self, img, arbitrary_input=False):
        B, C, H, W = img.shape
        p = self.patch_size
        reso = (H // p, W // p)
        tok = self._embed_tokens(img.astype(jnp.bfloat16))
        return tok, None, reso

    # ---- transModule: cross attention content <- style ----
    def transModule(self, f_c, f_s):
        B, Nk, D = f_s.shape
        # K/V projection hoisted out of the attention kv-loop: one matmul call,
        # K pre-transposed to [B, D, Nk] (one-time cost, no in-loop XLU work).
        kv = pallas_matmul_bias(f_s.reshape(B * Nk, D), self.w_kv, self.b_kv,
                                out_dtype=jnp.bfloat16).reshape(B, Nk, 2 * D)
        k_t = jnp.transpose(kv[..., :D], (0, 2, 1))            # [B, D, Nk]
        v = kv[..., D:]                                        # [B, Nk, D]
        return pallas_cross_attention(f_c, k_t, v, self.w_q, self.b_q,
                                      self.w_o, self.b_o)

    # ---- decoder: tokens -> image ----
    def decoder(self, f_cs, reso):
        B, N, D = f_cs.shape
        pix = pallas_matmul_bias(f_cs.reshape(B * N, D), self.w_dec, self.b_dec,
                                 out_dtype=jnp.float32)        # [B*N, 256] lane-dense
        pix = pix[:, :self.pdim]                               # drop lane padding
        return unpatchify(pix.reshape(B, N, self.pdim), reso, self.patch_size,
                          self.in_chans)

    # ---- Sample_Test_Net.forward ----
    def forward(self, i_c, i_s, arbitrary_input=False):
        B, C, H, W = i_c.shape
        self.img_H, self.img_W = H, W                    # mirrors decoder.img_H/W
        p = self.patch_size
        reso = (H // p, W // p)
        # Stack content + style and cast to bf16 BEFORE patchify: one bf16
        # transpose instead of two f32 transposes + concat. Mathematically
        # identical to two encoder() calls (per-token linear), one kernel.
        imgs = jnp.concatenate([i_c, i_s], axis=0).astype(jnp.bfloat16)
        tok = self._embed_tokens(imgs)
        f_c, f_s = tok[:B], tok[B:]
        f_cs = self.transModule(f_c, f_s)
        return self.decoder(f_cs, reso)


# ----------------------------------------------------------------------------
if __name__ == "__main__":
    key = jax.random.PRNGKey(0)
    k_c, k_s = jax.random.split(key)
    B, C, H, W = 2, 3, 32, 32                            # patch_size=8 -> 4x4 patches
    i_c = jax.random.normal(k_c, (B, C, H, W), jnp.float32)
    i_s = jax.random.normal(k_s, (B, C, H, W), jnp.float32)

    net = SampleTestNetPallas(in_chans=C, embed_dim=128, patch_size=8, seed=42)
    i_cs = jax.block_until_ready(net.forward(i_c, i_s))

    assert i_cs.shape == (B, C, H, W), i_cs.shape
    assert i_cs.dtype == jnp.float32
    assert bool(jnp.all(jnp.isfinite(i_cs)))
    print("KERNEL_OK")
</pallas_src>

<mosaic_0001>
module attributes {stable_mosaic.version = 11 : i64} {
  func.func @_matmul_bias_kernel(%arg0: i32, %arg1: memref<32x256xbf16, #tpu.memory_space<vmem>>, %arg2: memref<256x128xbf16, #tpu.memory_space<vmem>>, %arg3: memref<1x128xf32, #tpu.memory_space<vmem>>, %arg4: memref<32x128xbf16, #tpu.memory_space<vmem>>) attributes {dimension_semantics = [#tpu.dimension_semantics<parallel>], iteration_bounds = array<i64: 2>, scalar_prefetch = 0 : i64, scratch_operands = 0 : i64, tpu.core_type = #tpu.core_type<tc>, window_params = [{transform_indices = @transform_0, window_bounds = array<i64: 32, 256>}, {pipeline_mode = #tpu.pipeline_mode<synchronous>, transform_indices = @transform_1, window_bounds = array<i64: 256, 128>}, {pipeline_mode = #tpu.pipeline_mode<synchronous>, transform_indices = @transform_2, window_bounds = array<i64: 1, 128>}, {transform_indices = @transform_3, window_bounds = array<i64: 32, 128>}]} {
    %c0 = arith.constant 0 : index
    %c0_0 = arith.constant 0 : index
    %0 = vector.load %arg1[%c0, %c0_0] : memref<32x256xbf16, #tpu.memory_space<vmem>>, vector<32x256xbf16>
    %c0_1 = arith.constant 0 : index
    %c0_2 = arith.constant 0 : index
    %1 = vector.load %arg2[%c0_1, %c0_2] : memref<256x128xbf16, #tpu.memory_space<vmem>>, vector<256x128xbf16>
    %cst = arith.constant dense<0.000000e+00> : vector<32x128xf32>
    %2 = tpu.matmul %0, %1, %cst {dimension_numbers = #tpu.dot_dimension_numbers<[1], [0], [0], [1], [0, 0, 1, 1], [], []>} : vector<32x256xbf16>, vector<256x128xbf16>, vector<32x128xf32> -> vector<32x128xf32>
    %c0_3 = arith.constant 0 : index
    %c0_4 = arith.constant 0 : index
    %3 = vector.load %arg3[%c0_3, %c0_4] : memref<1x128xf32, #tpu.memory_space<vmem>>, vector<1x128xf32>
    %4 = vector.broadcast %3 : vector<1x128xf32> to vector<32x128xf32>
    %5 = arith.addf %2, %4 : vector<32x128xf32>
    %6 = arith.truncf %5 : vector<32x128xf32> to vector<32x128xbf16>
    %c0_5 = arith.constant 0 : index
    %c0_6 = arith.constant 0 : index
    %7 = vector.load %arg4[%c0_5, %c0_6] : memref<32x128xbf16, #tpu.memory_space<vmem>>, vector<32x128xbf16>
    tpu.vector_store %arg4[%c0_5, %c0_6], %6 {strides = array<i32>} : memref<32x128xbf16, #tpu.memory_space<vmem>>, vector<32x128xbf16>,
    return
  }
  func.func @transform_0(%arg0: i32) -> (i32, i32) {
    %c0_i32 = arith.constant 0 : i32
    %c0_i32_0 = arith.constant 0 : i32
    return %arg0, %c0_i32 : i32, i32
  }
  func.func @transform_1(%arg0: i32) -> (i32, i32) {
    %c0_i32 = arith.constant 0 : i32
    %c0_i32_0 = arith.constant 0 : i32
    %c0_i32_1 = arith.constant 0 : i32
    return %c0_i32, %c0_i32_0 : i32, i32
  }
  func.func @transform_2(%arg0: i32) -> (i32, i32) {
    %c0_i32 = arith.constant 0 : i32
    %c0_i32_0 = arith.constant 0 : i32
    %c0_i32_1 = arith.constant 0 : i32
    return %c0_i32, %c0_i32_0 : i32, i32
  }
  func.func @transform_3(%arg0: i32) -> (i32, i32) {
    %c0_i32 = arith.constant 0 : i32
    %c0_i32_0 = arith.constant 0 : i32
    return %arg0, %c0_i32 : i32, i32
  }
}

</mosaic_0001>

<bundles_post_ra>
// kernel: tpu_custom_call.1
= control target key start
LH: loop header
LB: loop body
LE: loop exit
PB: predicated region body
PF: predicated region fallthrough
CT: control target
= control target key end

     0   :  { %8 = vsyncpa [#allocation3], 0  ;;  %s1062_s0 = inlined_call_operand.hbm [shape: bf16[64,256], index: 0, kind: input, shape index: {}]   ;;  %s1063_s1 = inlined_call_operand.hbm [shape: bf16[256,128], index: 1, kind: input, shape index: {}]   ;;  %s1064_s2 = inlined_call_operand.vmem [shape: f32[1,128], index: 2, kind: input, shape index: {}]   ;;  %s1065_s3 = inlined_call_operand.hbm [shape: bf16[64,128], index: 3, kind: output, shape index: {}]  }
   0x1   :  { %10 = vsyncpa [#allocation3 + $0x1], 0 }
   0x2   :  { %11 = vsyncpa [#allocation6], 0 }
   0x3   :  { %12 = vsyncpa [#allocation4], 0 }
   0x4   :  { %14 = vsyncpa [#allocation4 + $0x1], 0  ;;  %s875_s12 = smov 0   ;;  %s877_s13 = smov 0  }
   0x5   :  { %s879_s14 = smov 0   ;;  %s881_s15 = smov 0  }
   0x6 LB: > { %s896_s16 = sadd.s32 4294967295, %s844_s15   ;;  %s533_s17 = sadd.s32 4294967294, %s844_s15   ;;  %s844_s15 = sphi %s881_s15, %s1087_s15   ;;  %s840_s14 = sphi %s879_s14, %s1086_s14   ;;  %s836_s13 = sphi %s877_s13, %s1085_s13   ;;  %s832_s12 = sphi %s875_s12, %s1084_s12  }
   0x7   : > { %p40_p0 = scmp.ne.s32.totalorder %s836_s13, %s832_s12  ;;  %p1066_p1 = scmp.eq.s32.totalorder %s896_s16, 0 }
   0x8   : > { %p112_p3 = scmp.eq.s32.totalorder %s533_s17, 1  ;;  %p534_p5 = scmp.ge.s32.totalorder %s844_s15, 1 }
   0x9   : > { %p905_p4 = por %p1066_p1, %p40_p0  ;;  %p119_p7 = scmp.lt.s32.totalorder %s844_s15, 3 }
   0xa   : > { %p910_p6 = por %p112_p3, %p40_p0  ;;  %s846_s21 = smov [#allocation5]  }
   0xb   : > { %s1070_s18 = scalar_select %p905_p4, 1, 0 }
   0xc   : > { %s1071_s19 = scalar_select %p910_p6, 1, 0 }
   0xd   : > { %p915_p8 = pnand %p534_p5, %p119_p7  ;;  %s131_s22 = sshll.u32 %s846_s21, 4  ;;  %s132_s22 = int_to_ptr.vmem [resolvable:$true] %s131_s22 }
   0xe   : > { %s929_s24 = sadd.s32 1, %s844_s15   ;;  %s27_s25 = sadd.s32 1, %s840_s14 }
   0xf   : > { %s1072_s20 = scalar_select %p915_p8, 1, 0 }
  0x10   : > { %p645_p9 = pneg %p915_p8  ;;  %s24_s26 = ssub.s32 %s844_s15, %s929_s24 }
  0x11   : > { %s733_s27 = scalar_lea.vmem %s132_s22, 2048  ;;  %p741_p5 = scmp.lt.s32.totalorder %s132_s22, %s132_s22 }
  0x12   : > { %p924_p11 = pnand %p645_p9, %p1066_p1  ;;  %p734_p13 = scmp.ne.s32.totalorder %s132_s22, %s733_s27 }
  0x13   : > { %p742_p7 = scmp.lt.s32.totalorder %s733_s27, %s733_s27 }
  0x14   : > { %p724_p12 = pneg %p924_p11 }
  0x15   : > { %p743_p10 = por %p742_p7, %p741_p5 }
  0x16   : > { %p736_p0 = pnand %p734_p13, %p724_p12 }
  0x18   : > { %p737_p3 = pneg %p736_p0 }
  0x1a   : > { %p744_p2 = pnand %p743_p10, %p737_p3 }
  0x1c   : > { %747 = shalt.err (!%p744_p2)
}
  0x1d   : > { %s847_s28 = smov 64   ;;  %s848_s29 = smov 4  }
  0x1e   : > { %648 = dma.hbm_to_vmem [thread:$0]  (!%p924_p11), %s1063_s1, 2048, %s132_s22, [#allocation6], %s847_s28, %s847_s28, %s848_s29  }
  0x1f   : > { %p25_p9 = scmp.eq.s32.totalorder %s24_s26, 0  ;;  %p34_p12 = scmp.ne.s32.totalorder %s840_s14, %s836_s13 }
  0x20   : > { %p35_p10 = scmp.eq.s32.totalorder %s844_s15, 0  ;;  %p658_p2 = scmp.lt.s32.totalorder %s844_s15, 2 }
  0x21   : > { %s946_s5 = scalar_select %p25_p9, %s840_s14, %s27_s25  }
  0x22   : > { %p36_p13 = por %p35_p10, %p34_p12  ;;  %p1074_p0 = scmp.eq.s32.totalorder %s896_s16, 1 }
  0x23   : > { %s148_s7 = sand.u32 1, %s840_s14   ;;  %s576_s8 = sshll.u32 %s844_s15, 9 }
  0x24   : > { %p950_p3 = por %p1074_p0, %p34_p12  ;;  %s537_s9 = sshll.u32 %s148_s7, 5 }
  0x25   : > { %s959_s17 = scalar_lea.hbm %s1062_s0, %s576_s8  ;;  %s152_s21 = scalar_lea.vmem [#allocation2], %s537_s9 }
  0x26   : > { %s1075_s6 = scalar_select %p950_p3, 1, 0 }
  0x27   : > { %s160_s22 = sshll.u32 %s152_s21, 4  ;;  %p961_p11 = pnand %p658_p2, %p36_p13  ;;  %s965_s22 = int_to_ptr.vmem [resolvable:$true] %s160_s22 }
  0x28   : > { %s967_s25 = scalar_lea.sflag [#allocation3], %s148_s7  ;;  %s748_s26 = scalar_lea.hbm %s959_s17, 512 }
  0x29   : > { %p749_p5 = scmp.ne.s32.totalorder %s959_s17, %s748_s26  ;;  %p750_p7 = pneg %p961_p11 }
  0x2a   : > { %s753_s29 = scalar_lea.hbm %s1062_s0, 1024  ;;  %p754_p10 = scmp.lt.s32.totalorder %s959_s17, %s1062_s0 }
  0x2b   : > { %p751_p9 = pnand %p750_p7, %p749_p5  ;;  %p755_p2 = scmp.lt.s32.totalorder %s753_s29, %s748_s26 }
  0x2d   : > { %p752_p12 = pneg %p751_p9  ;;  %p756_p13 = por %p755_p2, %p754_p10 }
  0x2f   : > { %p757_p0 = pnand %p756_p13, %p752_p12 }
  0x31   : > { %760 = shalt.err (!%p757_p0)
}
  0x32   : > { %s761_s7 = scalar_lea.vmem %s965_s22, 512  ;;  %s849_s8 = smov [#allocation2]  }
  0x33   : > { %p762_p1 = scmp.ne.s32.totalorder %s965_s22, %s761_s7  ;;  %s766_s9 = sshll.u32 %s849_s8, 4  ;;  %s767_s9 = int_to_ptr.vmem [resolvable:$false] %s766_s9 }
  0x34   : > { %s768_s10 = scalar_lea.vmem %s767_s9, 1024  ;;  %p769_p9 = scmp.lt.s32.totalorder %s965_s22, %s767_s9 }
  0x35   : > { %p764_p6 = pnand %p762_p1, %p750_p7  ;;  %p770_p3 = scmp.lt.s32.totalorder %s768_s10, %s761_s7 }
  0x37   : > { %p765_p5 = pneg %p764_p6  ;;  %p771_p4 = por %p770_p3, %p769_p9 }
  0x39   : > { %p772_p8 = pnand %p771_p4, %p765_p5 }
  0x3b   : > { %775 = shalt.err (!%p772_p8)
}
  0x3c   : > { %s850_s11 = smov 128   ;;  %s851_s21 = smov 8  }
  0x3d   : > { %652 = dma.hbm_to_vmem [thread:$0]  (!%p961_p11), %s959_s17, 512, %s965_s22, %s967_s25, %s850_s11, %s850_s11, %s851_s21  }
  0x3e   : > { %p1077_p1 = scmp.ne.s32.totalorder %s1072_s20, 0 }
  0x3f   : > { %s991_s26 = sand.u32 (!%p1077_p1), 1, %s836_s13   ;;  %p1078_p4 = scmp.ne.s32.totalorder (!%p1077_p1), %s1070_s18, 0 }
  0x40   : > { %172 = sbr.rel (%p1077_p1) target bundleno = 325 (0x145), region = 32  ;;  %s542_s27 = sshll.u32 (!%p1077_p1), %s991_s26, 5 }
  0x41   : > { %s175_s28 = scalar_lea.sflag (!%p1077_p1), [#allocation3], %s991_s26  ;;  %s995_s29 = scalar_lea.vmem (!%p1077_p1), [#allocation2], %s542_s27 }
  0x45   : > { %819 = dma.done.wait (%p1078_p4), %s175_s28, 512  }
  0x46   : > { %821 = vsyncadd (%p1078_p4), %s175_s28, 4294966784  ;;  %p1079_p6 = scmp.eq.s32.totalorder %s896_s16, 0 }
  0x48   : > { %823 = dma.done.wait (%p1079_p6), [#allocation6], 2048   ;;  %p1080_p8 = pmov %p1079_p6 }
  0x49   : > { %v700_v0 = vld [vmem:[#allocation5 + $0x78] sm:$0xff]   ;;  %v702_v2 = vld [vmem:[#allocation5 + $0x70] sm:$0xff]   ;;  %v704_v4 = vld [vmem:[#allocation5 + $0x68] sm:$0xff]   ;;  %s544_s18 = sshll.u32 %s991_s26, 4  ;;  %s581_s25 = sshll.u32 %s896_s16, 8 }
  0x4a   : > { %825 = vsyncadd (%p1080_p8), [#allocation6], 4294965248  ;;  %v701_v1 = vld [vmem:[#allocation5 + $0x38] sm:$0xff]   ;;  %593 = vmatprep.subr.bf16.mxu0 %v700_v0  ;;  %621 = vmatprep.subr.bf16.mxu1 %v700_v0  ;;  %v703_v3 = vld [vmem:[#allocation5 + $0x30] sm:$0xff]   ;;  %s204_s22 = scalar_lea.vmem [#allocation7], %s544_s18  ;;  %s1019_s7 = scalar_lea.hbm %s1065_s3, %s581_s25 }
  0x4b   : > { %594 = vmatpush3.bf16.msra.mxu0 %v701_v1  ;;  %629 = vmatpush3.bf16.msra.mxu1 %v701_v1  ;;  %v705_v5 = vld [vmem:[#allocation5 + $0x28] sm:$0xff]   ;;  %v706_v6 = vld [vmem:[#allocation5 + $0x60] sm:$0xff]   ;;  %v708_v8 = vld [vmem:[#allocation5 + $0x58] sm:$0xff]   ;;  %s450_s23 = sshll.u32 %s204_s22, 4  ;;  %s437_s8 = scalar_lea.sflag [#allocation4], %s991_s26  ;;  %s1014_s23 = int_to_ptr.vmem [resolvable:$true] %s450_s23 }
  0x4c   : > { %595 = vmatprep.subr.bf16.mxu0 %v702_v2  ;;  %622 = vmatprep.subr.bf16.mxu1 %v702_v2  ;;  %v707_v7 = vld [vmem:[#allocation5 + $0x20] sm:$0xff]   ;;  %v709_v9 = vld [vmem:[#allocation5 + $0x18] sm:$0xff]   ;;  %v710_v10 = vld [vmem:[#allocation5 + $0x50] sm:$0xff]   ;;  %s776_s16 = scalar_lea.vmem %s1014_s23, 256  ;;  %p1081_p11 = scmp.ne.s32.totalorder %s1075_s6, 0 }
  0x4d   : > { %v718_v11 = vld [vmem:[%s995_s29 + $0x4] ss:$8 sps:$4 sm:$0xff]   ;;  %v721_v12 = vld [vmem:[%s995_s29 + $0x14] ss:$8 sps:$4 sm:$0xff]   ;;  %v716_v18 = vld [vmem:[%s995_s29] ss:$8 sps:$4 sm:$0xff]   ;;  %p777_p3 = scmp.ne.s32.totalorder %s1014_s23, %s776_s16 }
  0x4e   : > { %v711_v13 = vld [vmem:[#allocation5 + $0x10] sm:$0xff]   ;;  %v712_v14 = vld [vmem:[#allocation5 + $0x48] sm:$0xff]   ;;  %399 = vmatprep.mubr.bf16.mxu0 %v718_v11  ;;  %407 = vmatprep.mubr.bf16.mxu1 %v721_v12  ;;  %v714_v16 = vld [vmem:[#allocation5 + $0x40] sm:$0xff]   ;;  %s852_s9 = smov [#allocation7]  }
  0x4f   : > { %596 = vmatpush3.bf16.msra.mxu0 %v703_v3  ;;  %630 = vmatpush3.bf16.msra.mxu1 %v703_v3  ;;  %v713_v15 = vld [vmem:[#allocation5 + $0x8] sm:$0xff]   ;;  %v715_v17 = vld [vmem:[#allocation5] sm:$0xff]   ;;  %v719_v19 = vld [vmem:[%s995_s29 + $0x10] ss:$8 sps:$4 sm:$0xff]   ;;  %p778_p7 = pnand %p777_p3, %p1081_p11  ;;  %s780_s10 = sshll.u32 %s852_s9, 4  ;;  %s781_s10 = int_to_ptr.vmem [resolvable:$false] %s780_s10 }
  0x50   : > { %597 = vmatprep.subr.bf16.mxu0 %v704_v4  ;;  %623 = vmatprep.subr.bf16.mxu1 %v704_v4  ;;  %v545_v28 = vld [vmem:[%s1064_s2] ss:$0 sm:$0xff]  ;;  %s782_s11 = scalar_lea.vmem %s781_s10, 512  ;;  %p783_p10 = scmp.lt.s32.totalorder %s1014_s23, %s781_s10 }
  0x51   : > { %p779_p12 = pneg %p778_p7  ;;  %p784_p2 = scmp.lt.s32.totalorder %s782_s11, %s776_s16 }
  0x53   : > { %598 = vmatpush3.bf16.msra.mxu0 %v705_v5  ;;  %631 = vmatpush3.bf16.msra.mxu1 %v705_v5  ;;  %p785_p13 = por %p784_p2, %p783_p10 }
  0x54   : > { %599 = vmatprep.subr.bf16.mxu0 %v706_v6  ;;  %624 = vmatprep.subr.bf16.mxu1 %v706_v6 }
  0x55   : > { %p786_p0 = pnand %p785_p13, %p779_p12 }
  0x57   : > { %600 = vmatpush3.bf16.msra.mxu0 %v707_v7  ;;  %632 = vmatpush3.bf16.msra.mxu1 %v707_v7 }
  0x58   : > { %601 = vmatprep.subr.bf16.mxu0 %v708_v8  ;;  %625 = vmatprep.subr.bf16.mxu1 %v708_v8 }
  0x5b   : > { %602 = vmatpush3.bf16.msra.mxu0 %v709_v9  ;;  %633 = vmatpush3.bf16.msra.mxu1 %v709_v9 }
  0x5c   : > { %603 = vmatprep.subr.bf16.mxu0 %v710_v10  ;;  %626 = vmatprep.subr.bf16.mxu1 %v710_v10 }
  0x5f   : > { %604 = vmatpush3.bf16.msra.mxu0 %v711_v13  ;;  %634 = vmatpush3.bf16.msra.mxu1 %v711_v13 }
  0x60   : > { %605 = vmatprep.subr.bf16.mxu0 %v712_v14  ;;  %627 = vmatprep.subr.bf16.mxu1 %v712_v14 }
  0x63   : > { %606 = vmatpush3.bf16.msra.mxu0 %v713_v15  ;;  %635 = vmatpush3.bf16.msra.mxu1 %v713_v15 }
  0x64   : > { %607 = vmatprep.subr.bf16.mxu0 %v714_v16  ;;  %628 = vmatprep.subr.bf16.mxu1 %v714_v16 }
  0x67   : > { %608 = vmatpush3.bf16.msra.mxu0 %v715_v17  ;;  %636 = vmatpush3.bf16.msra.mxu1 %v715_v17 }
  0x6a   : > { %400 = vmatmul.mubr.bf16.vlgmr.msra.gmra.mxu0 %v716_v18  ;;  %408 = vmatmul.mubr.bf16.vlgmr.msra.gmra.mxu1 %v719_v19 }
 0x12a   : > { %v609_v20 = vpop.f32.mrf.mxu0  ;;  %v615_v21 = vpop.f32.mrf.mxu1 }
 0x12c   : > { %v610_v22 = vpop.f32.mrf.mxu0  ;;  %v616_v23 = vpop.f32.mrf.mxu1 }
 0x12d   : > { %v611_v26 = vadd.f32 %v610_v22, %v609_v20  ;;  %v617_v27 = vadd.f32 %v616_v23, %v615_v21 }
 0x12e   : > { %v612_v24 = vpop.f32.mrf.mxu0  ;;  %v618_v25 = vpop.f32.mrf.mxu1 }
 0x12f   : > { %v402_v33 = vadd.f32 %v611_v26, %v545_v28  ;;  %v410_v34 = vadd.f32 %v617_v27, %v545_v28 }
 0x130   : > { %v613_v29 = vpop.f32.mrf.mxu0  ;;  %v619_v30 = vpop.f32.mrf.mxu1 }
 0x131   : > { %v614_v31 = vadd.f32 %v613_v29, %v612_v24  ;;  %v620_v32 = vadd.f32 %v619_v30, %v618_v25 }
 0x133   : > { %v405_v35 = vadd.f32 %v614_v31, %v545_v28  ;;  %v413_v36 = vadd.f32 %v620_v32, %v545_v28 }
 0x135   : > { %v585_v37 = vpack.c.bf16 %v405_v35, %v402_v33  ;;  %v590_v38 = vpack.c.bf16 %v413_v36, %v410_v34 }
 0x137   : > { %586 = vst [vmem:[%s204_s22] sm:$0xff] %v585_v37   ;;  %592 = vst [vmem:[%s204_s22 + $0x8] sm:$0xff] %v590_v38  }
 0x138   : > { %789 = shalt.err (!%p786_p0)
}
 0x139   : > { %s790_s21 = scalar_lea.hbm %s1019_s7, 256  ;;  %s794_s29 = scalar_lea.hbm %s1065_s3, 512 }
 0x13a   : > { %p791_p5 = scmp.ne.s32.totalorder %s1019_s7, %s790_s21  ;;  %p795_p4 = scmp.lt.s32.totalorder %s1019_s7, %s1065_s3 }
 0x13b   : > { %p796_p6 = scmp.lt.s32.totalorder %s794_s29, %s790_s21 }
 0x13c   : > { %p792_p9 = pnand %p791_p5, %p1081_p11 }
 0x13d   : > { %p797_p8 = por %p796_p6, %p795_p4 }
 0x13e   : > { %p793_p1 = pneg %p792_p9 }
 0x140   : > { %p798_p3 = pnand %p797_p8, %p793_p1 }
 0x142   : > { %801 = shalt.err (!%p798_p3)
}
 0x143   : > { %s853_s17 = smov 64   ;;  %s854_s22 = smov 4  }
 0x144   : > { %643 = dma.vmem_to_hbm [thread:$0]  (%p1081_p11), %s1014_s23, 256, %s1019_s7, %s437_s8, %s853_s17, %s853_s17, %s854_s22  }
 0x145 PF: > { %s465_s25 = sand.u32 1, %s832_s12   ;;  %p1082_p7 = scmp.ne.s32.totalorder %s1071_s19, 0 }
 0x146   : > { %p1083_p12 = scmp.ge.s32.totalorder %s844_s15, 2  ;;  %s466_s30 = scalar_lea.sflag [#allocation4], %s465_s25 }
 0x148   : > { %p654_p10 = pnand %p1083_p12, %p1082_p7 }
 0x14a   : > { %p655_p2 = pneg %p654_p10 }
 0x14c   : > { %827 = dma.done.wait (%p655_p2), %s466_s30, 256  }
 0x14d   : > { %829 = vsyncadd (%p655_p2), %s466_s30, 4294967040  ;;  %p17_p13 = scmp.ge.s32.totalorder %s929_s24, 4   ;;  %s1084_s12 = smov %s836_s13 }
 0x14e   : > { %s1085_s13 = smov %s840_s14  ;;  %s1086_s14 = smov %s946_s5 }
 0x14f   : > { %s1087_s15 = smov %s929_s24  ;;  %19 = sbr.rel (!%p17_p13) target bundleno = 6 (0x6), region = 81 }
 0x154   :  { %471 = vsyncpa [#allocation3], 1 }
 0x155   :  { %473 = vsyncpa [#allocation3 + $0x1], 1 }
 0x156   :  { %474 = vsyncpa [#allocation6], 1 }
 0x157   :  { %475 = vsyncpa [#allocation4], 1 }
 0x158   :  { %477 = vsyncpa [#allocation4 + $0x1], 1 }

</bundles_post_ra>
